<compile_context>
chip_gen: v6e
topology: v6e:2x2x1
jax: 0.10.0
libtpu: 0.0.40
codegen_flags: <defaults>
</compile_context>

<pallas_src>
import functools

import numpy as np
import jax
import jax.numpy as jnp
from jax.experimental import pallas as pl
from jax.experimental.pallas import tpu as pltpu

# segment offsets / sizes (must sum to 94)
SEG_OFFS = (0, 20, 26, 47, 67, 73)
SEG_SIZES = (20, 6, 21, 20, 6, 21)
FEAT = 94
NSEG = 6
LANE = 128  # VMEM rows are lane-padded to 128 regardless of FEAT=94

# Constant segment matrices (built once, at import time).
#   A[f, s] = 1/size_s  if feature f belongs to segment s   (squeeze / averaging)
#   E[s, f] = 1         if feature f belongs to segment s   (gate broadcast)
_A_NP = np.zeros((FEAT, NSEG), np.float32)
_E_NP = np.zeros((NSEG, FEAT), np.float32)
for _s, (_off, _sz) in enumerate(zip(SEG_OFFS, SEG_SIZES)):
    _A_NP[_off:_off + _sz, _s] = 1.0 / _sz
    _E_NP[_s, _off:_off + _sz] = 1.0


def _round_up(n, m):
    return (n + m - 1) // m * m


def senet_kernel(x_ref, aw1_ref, b1_ref, w2e_ref, b2e_ref, o_ref):
    # x_ref:   (TB, 94)    batch tile, native dtype (f32 or bf16)
    # aw1_ref: (94, 2)     = A @ W1   (squeeze + fc1 fused), same dtype as x
    # b1_ref:  (1, 2)      f32
    # w2e_ref: (2, 94)     = W2 @ E   (fc2 + gate broadcast fused), f32
    # b2e_ref: (1, 94)     = b2 @ E,  f32
    # o_ref:   (TB, 94)
    x = x_ref[...]  # no unconditional f32 upcast; MXU takes the native dtype

    # squeeze + fc1: h = relu(mean_segments(x) @ W1 + b1) == relu(x @ (A @ W1) + b1)
    h = jnp.dot(x, aw1_ref[...], preferred_element_type=jnp.float32) + b1_ref[...]
    h = jnp.maximum(h, 0.0)                                   # (TB, 2) f32

    # fc2 + sigmoid + per-segment gating.  A (TB,2)@(2,94) MXU dot would waste vmatmul
    # pushes / result pops at <1% utilization, so use two VPU broadcast-FMAs instead.
    z = (h[:, 0:1] * w2e_ref[0:1, :]
         + h[:, 1:2] * w2e_ref[1:2, :]
         + b2e_ref[...])                                      # (TB, 94) f32
    gate = jax.nn.sigmoid(z)                                  # f32 (EUP exp)

    if x_ref.dtype == jnp.float32:
        out = x * gate
    else:
        # bf16 path: downcast the gate instead of upcasting the whole x tile.
        out = x * gate.astype(x_ref.dtype)
    o_ref[...] = out.astype(o_ref.dtype)


@functools.partial(jax.jit, static_argnames=("block_b",))
def senet_forward(x, w1, b1, w2, b2, *, block_b=4096):
    """SENet forward (eval mode).

    x:  (B, 94)      f32 or bf16; MXU accumulation is always f32.
    w1: (6, 2)       fc1 weight, transposed vs. PyTorch's (2, 6)
    b1: (2,)         fc1 bias
    w2: (2, 6)       fc2 weight, transposed vs. PyTorch's (6, 2)
    b2: (6,)         fc2 bias
    """
    B, F = x.shape
    assert F == FEAT, f"expected {FEAT} features, got {F}"

    itemsize = jnp.dtype(x.dtype).itemsize
    mult = max(8, 32 // itemsize)          # sublane multiple: 8 (f32), 16 (bf16)

    # Fold the constant segment matrices into the tiny weights (trace-time, outside
    # the kernel; ~hundreds of flops total).
    a_mat = jnp.asarray(_A_NP)                                      # (94, 6)
    e_mat = jnp.asarray(_E_NP)                                      # (6, 94)
    aw1 = jnp.dot(a_mat, w1.astype(jnp.float32)).astype(x.dtype)    # (94, 2), MXU-native
    b1_2d = b1.astype(jnp.float32).reshape(1, 2)                    # (1, 2)
    w2e = jnp.dot(w2.astype(jnp.float32), e_mat)                    # (2, 94)
    b2e = jnp.dot(b2.astype(jnp.float32).reshape(1, NSEG), e_mat)   # (1, 94)

    # Batch tile selection:
    #  * grid >= 2 whenever possible so both v7x TensorCores get work,
    #  * capped so 2x double-buffered (in + out) lane-padded tiles stay well inside
    #    the tightest scoped-VMEM budget (v7x: 64 MiB physical / 32 MiB default).
    vmem_budget = 24 * 1024 * 1024
    max_bb = max(mult, (vmem_budget // (4 * LANE * itemsize)) // mult * mult)
    bb = min(int(block_b), _round_up(pl.cdiv(B, 2), mult), max_bb)
    bb = max(mult, _round_up(bb, mult))
    # No padding / trailing slice: Pallas masks the writeback of the partial last block.
    grid = (pl.cdiv(B, bb),)

    cost = pl.CostEstimate(
        flops=int(B * (2 * F * 2 + 5 * F + 3 * F)),          # thin dot + VPU FMAs + gate mul
        transcendentals=int(B * F),                           # sigmoid
        bytes_accessed=int(2 * B * F * itemsize
                           + 4 * (aw1.size + b1_2d.size + w2e.size + b2e.size)),
    )

    return pl.pallas_call(
        senet_kernel,
        out_shape=jax.ShapeDtypeStruct((B, FEAT), x.dtype),
        grid_spec=pl.GridSpec(
            grid=grid,
            in_specs=[
                pl.BlockSpec((bb, FEAT), lambda i: (i, 0)),    # x batch tile
                pl.BlockSpec((FEAT, 2), lambda i: (0, 0)),     # A @ W1
                pl.BlockSpec((1, 2), lambda i: (0, 0)),        # b1
                pl.BlockSpec((2, FEAT), lambda i: (0, 0)),     # W2 @ E
                pl.BlockSpec((1, FEAT), lambda i: (0, 0)),     # b2 @ E
            ],
            out_specs=pl.BlockSpec((bb, FEAT), lambda i: (i, 0)),
        ),
        compiler_params=pltpu.CompilerParams(
            dimension_semantics=("parallel",),                 # shards across TCs on v7x
            vmem_limit_bytes=32 * 1024 * 1024,                 # allow larger tiles on v5e
        ),
        cost_estimate=cost,
    )(x, aw1, b1_2d, w2e, b2e)


def reference_forward(x, w1, b1, w2, b2):
    """Pure-JAX reference mirroring the PyTorch forward (eval mode)."""
    segs = [x[:, o:o + s] for o, s in zip(SEG_OFFS, SEG_SIZES)]
    m = jnp.stack([jnp.mean(s.astype(jnp.float32), axis=1) for s in segs], axis=1)
    h = jnp.maximum(m @ w1 + b1, 0.0)
    g = jax.nn.sigmoid(h @ w2 + b2)                                 # (B, 6)
    outs = [g[:, i:i + 1] * segs[i].astype(jnp.float32) for i in range(6)]
    return jnp.concatenate(outs, axis=1)


if __name__ == "__main__":
    key = jax.random.PRNGKey(0)
    k_x, k_w1, k_b1, k_w2, k_b2 = jax.random.split(key, 5)

    # Small, deterministic problem; B=37 is intentionally ragged (not a multiple of the
    # tile) to exercise the pad-free cdiv grid with a masked partial last block.
    B = 37
    x = jax.random.normal(k_x, (B, FEAT), dtype=jnp.float32)

    # nn.Linear(6, 2): PyTorch weight (2, 6) stored transposed as (6, 2); bias (2,)
    # nn.Linear(2, 6): PyTorch weight (6, 2) stored transposed as (2, 6); bias (6,)
    w1 = jax.random.uniform(k_w1, (6, 2), jnp.float32, minval=-0.4, maxval=0.4)
    b1 = jax.random.uniform(k_b1, (2,), jnp.float32, minval=-0.4, maxval=0.4)
    w2 = jax.random.uniform(k_w2, (2, 6), jnp.float32, minval=-0.7, maxval=0.7)
    b2 = jax.random.uniform(k_b2, (6,), jnp.float32, minval=-0.7, maxval=0.7)

    ref = reference_forward(x, w1, b1, w2, b2)

    # multi-tile path (ragged batch, 3 grid steps, masked tail block)
    out = jax.block_until_ready(senet_forward(x, w1, b1, w2, b2, block_b=16))
    assert out.shape == (B, FEAT)
    assert jnp.allclose(out, ref, atol=1e-5, rtol=1e-5), "mismatch vs reference (tiled)"

    # default-tile path (grid of 2 "parallel" steps for this small batch)
    out2 = jax.block_until_ready(senet_forward(x, w1, b1, w2, b2))
    assert jnp.allclose(out2, ref, atol=1e-5, rtol=1e-5), "mismatch vs reference (default)"

    # bf16 I/O path (half the HBM bytes; gate math stays f32, gating multiply in bf16)
    xb = x.astype(jnp.bfloat16)
    outb = jax.block_until_ready(senet_forward(xb, w1, b1, w2, b2))
    refb = reference_forward(xb.astype(jnp.float32), w1, b1, w2, b2)
    assert outb.dtype == jnp.bfloat16 and outb.shape == (B, FEAT)
    assert jnp.allclose(outb.astype(jnp.float32), refb, atol=3e-2, rtol=3e-2), \
        "mismatch vs reference (bf16)"

    print("KERNEL_OK")
</pallas_src>

<mosaic_0001>
module attributes {stable_mosaic.version = 11 : i64} {
  func.func @senet_kernel(%arg0: i32, %arg1: memref<16x94xf32, #tpu.memory_space<vmem>>, %arg2: memref<94x2xf32, #tpu.memory_space<vmem>>, %arg3: memref<1x2xf32, #tpu.memory_space<vmem>>, %arg4: memref<2x94xf32, #tpu.memory_space<vmem>>, %arg5: memref<1x94xf32, #tpu.memory_space<vmem>>, %arg6: memref<16x94xf32, #tpu.memory_space<vmem>>) attributes {dimension_semantics = [#tpu.dimension_semantics<parallel>], iteration_bounds = array<i64: 3>, scalar_prefetch = 0 : i64, scratch_operands = 0 : i64, tpu.core_type = #tpu.core_type<tc>, window_params = [{transform_indices = @transform_0, window_bounds = array<i64: 16, 94>}, {pipeline_mode = #tpu.pipeline_mode<synchronous>, transform_indices = @transform_1, window_bounds = array<i64: 94, 2>}, {pipeline_mode = #tpu.pipeline_mode<synchronous>, transform_indices = @transform_2, window_bounds = array<i64: 1, 2>}, {pipeline_mode = #tpu.pipeline_mode<synchronous>, transform_indices = @transform_3, window_bounds = array<i64: 2, 94>}, {pipeline_mode = #tpu.pipeline_mode<synchronous>, transform_indices = @transform_4, window_bounds = array<i64: 1, 94>}, {transform_indices = @transform_5, window_bounds = array<i64: 16, 94>}]} {
    %c0 = arith.constant 0 : index
    %c0_0 = arith.constant 0 : index
    %0 = vector.load %arg1[%c0, %c0_0] : memref<16x94xf32, #tpu.memory_space<vmem>>, vector<16x94xf32>
    %c0_1 = arith.constant 0 : index
    %c0_2 = arith.constant 0 : index
    %1 = vector.load %arg2[%c0_1, %c0_2] : memref<94x2xf32, #tpu.memory_space<vmem>>, vector<94x2xf32>
    %cst = arith.constant dense<0.000000e+00> : vector<16x2xf32>
    %2 = tpu.matmul %0, %1, %cst {dimension_numbers = #tpu.dot_dimension_numbers<[1], [0], [0], [1], [0, 0, 1, 1], [], []>} : vector<16x94xf32>, vector<94x2xf32>, vector<16x2xf32> -> vector<16x2xf32>
    %c0_3 = arith.constant 0 : index
    %c0_4 = arith.constant 0 : index
    %3 = vector.load %arg3[%c0_3, %c0_4] : memref<1x2xf32, #tpu.memory_space<vmem>>, vector<1x2xf32>
    %4 = vector.broadcast %3 : vector<1x2xf32> to vector<16x2xf32>
    %5 = arith.addf %2, %4 : vector<16x2xf32>
    %cst_5 = arith.constant 0.000000e+00 : f32
    %6 = vector.broadcast %cst_5 : f32 to vector<16x2xf32>
    %7 = arith.maximumf %5, %6 : vector<16x2xf32>
    %8 = vector.extract_strided_slice %7 {offsets = [0, 0], sizes = [16, 1], strides = [1, 1]} : vector<16x2xf32> to vector<16x1xf32>
    %c0_6 = arith.constant 0 : index
    %c0_7 = arith.constant 0 : index
    %9 = vector.load %arg4[%c0_6, %c0_7] : memref<2x94xf32, #tpu.memory_space<vmem>>, vector<1x94xf32>
    %10 = vector.broadcast %8 : vector<16x1xf32> to vector<16x94xf32>
    %11 = vector.broadcast %9 : vector<1x94xf32> to vector<16x94xf32>
    %12 = arith.mulf %10, %11 : vector<16x94xf32>
    %13 = vector.extract_strided_slice %7 {offsets = [0, 1], sizes = [16, 1], strides = [1, 1]} : vector<16x2xf32> to vector<16x1xf32>
    %c1 = arith.constant 1 : index
    %c0_8 = arith.constant 0 : index
    %14 = vector.load %arg4[%c1, %c0_8] : memref<2x94xf32, #tpu.memory_space<vmem>>, vector<1x94xf32>
    %15 = vector.broadcast %13 : vector<16x1xf32> to vector<16x94xf32>
    %16 = vector.broadcast %14 : vector<1x94xf32> to vector<16x94xf32>
    %17 = arith.mulf %15, %16 : vector<16x94xf32>
    %18 = arith.addf %12, %17 : vector<16x94xf32>
    %c0_9 = arith.constant 0 : index
    %c0_10 = arith.constant 0 : index
    %19 = vector.load %arg5[%c0_9, %c0_10] : memref<1x94xf32, #tpu.memory_space<vmem>>, vector<1x94xf32>
    %20 = vector.broadcast %19 : vector<1x94xf32> to vector<16x94xf32>
    %21 = arith.addf %18, %20 : vector<16x94xf32>
    %22 = arith.negf %21 : vector<16x94xf32>
    %23 = math.exp %22 : vector<16x94xf32>
    %cst_11 = arith.constant 1.000000e+00 : f32
    %24 = vector.broadcast %cst_11 : f32 to vector<16x94xf32>
    %25 = arith.addf %24, %23 : vector<16x94xf32>
    %26 = arith.divf %24, %25 : vector<16x94xf32>
    %27 = arith.mulf %0, %26 : vector<16x94xf32>
    %c0_12 = arith.constant 0 : index
    %c0_13 = arith.constant 0 : index
    %28 = vector.load %arg6[%c0_12, %c0_13] : memref<16x94xf32, #tpu.memory_space<vmem>>, vector<16x94xf32>
    tpu.vector_store %arg6[%c0_12, %c0_13], %27 {strides = array<i32>} : memref<16x94xf32, #tpu.memory_space<vmem>>, vector<16x94xf32>,
    return
  }
  func.func @transform_0(%arg0: i32) -> (i32, i32) {
    %c0_i32 = arith.constant 0 : i32
    %c0_i32_0 = arith.constant 0 : i32
    return %arg0, %c0_i32 : i32, i32
  }
  func.func @transform_1(%arg0: i32) -> (i32, i32) {
    %c0_i32 = arith.constant 0 : i32
    %c0_i32_0 = arith.constant 0 : i32
    %c0_i32_1 = arith.constant 0 : i32
    return %c0_i32, %c0_i32_0 : i32, i32
  }
  func.func @transform_2(%arg0: i32) -> (i32, i32) {
    %c0_i32 = arith.constant 0 : i32
    %c0_i32_0 = arith.constant 0 : i32
    %c0_i32_1 = arith.constant 0 : i32
    return %c0_i32, %c0_i32_0 : i32, i32
  }
  func.func @transform_3(%arg0: i32) -> (i32, i32) {
    %c0_i32 = arith.constant 0 : i32
    %c0_i32_0 = arith.constant 0 : i32
    %c0_i32_1 = arith.constant 0 : i32
    return %c0_i32, %c0_i32_0 : i32, i32
  }
  func.func @transform_4(%arg0: i32) -> (i32, i32) {
    %c0_i32 = arith.constant 0 : i32
    %c0_i32_0 = arith.constant 0 : i32
    %c0_i32_1 = arith.constant 0 : i32
    return %c0_i32, %c0_i32_0 : i32, i32
  }
  func.func @transform_5(%arg0: i32) -> (i32, i32) {
    %c0_i32 = arith.constant 0 : i32
    %c0_i32_0 = arith.constant 0 : i32
    return %arg0, %c0_i32 : i32, i32
  }
}

</mosaic_0001>

<bundles_post_ra>
// kernel: senet_forward.1
= control target key start
LH: loop header
LB: loop body
LE: loop exit
PB: predicated region body
PF: predicated region fallthrough
CT: control target
= control target key end

     0   :  { %10 = vsyncpa [#allocation3], 0  ;;  %s893_s0 = inlined_call_operand.vmem [shape: f32[37,94], index: 0, kind: input, shape index: {}]   ;;  %s894_s1 = inlined_call_operand.vmem [shape: f32[94,2], index: 1, kind: input, shape index: {}]   ;;  %s895_s2 = inlined_call_operand.vmem [shape: f32[1,2], index: 2, kind: input, shape index: {}]   ;;  %s896_s3 = inlined_call_operand.vmem [shape: f32[2,94], index: 3, kind: input, shape index: {}]   ;;  %s897_s4 = inlined_call_operand.vmem [shape: f32[1,94], index: 4, kind: input, shape index: {}]   ;;  %s898_s5 = inlined_call_operand.hbm [shape: f32[37,94], index: 5, kind: output, shape index: {}]  }
   0x1   :  { %12 = vsyncpa [#allocation3 + $0x1], 0  ;;  %s717_s18 = smov 0   ;;  %s719_s19 = smov 0  }
   0x2   :  { %s721_s20 = smov 0   ;;  %s723_s21 = smov 0  }
   0x3 LB: > { %s738_s22 = sadd.s32 4294967295, %s680_s21   ;;  %s500_s23 = sadd.s32 4294967294, %s680_s21   ;;  %s680_s21 = sphi %s723_s21, %s904_s21   ;;  %s676_s20 = sphi %s721_s20, %s903_s20   ;;  %s672_s19 = sphi %s719_s19, %s902_s19   ;;  %s668_s18 = sphi %s717_s18, %s901_s18  }
   0x4   : > { %s742_s24 = sadd.s32 1, %s680_s21   ;;  %s135_s25 = sadd.s32 1, %s676_s20 }
   0x5   : > { %s132_s26 = ssub.s32 %s680_s21, %s742_s24  ;;  %p145_p0 = scmp.ne.s32.totalorder %s676_s20, %s672_s19 }
   0x6   : > { %p133_p1 = scmp.eq.s32.totalorder %s132_s26, 0  ;;  %p146_p2 = scmp.eq.s32.totalorder %s738_s22, 2 }
   0x7   : > { %p151_p3 = scmp.ne.s32.totalorder %s672_s19, %s668_s18  ;;  %p152_p4 = scmp.eq.s32.totalorder %s500_s23, 2 }
   0x8   : > { %s753_s27 = scalar_select %p133_p1, %s676_s20, %s135_s25  }
   0x9   : > { %p755_p5 = por %p146_p2, %p145_p0  ;;  %p759_p6 = por %p152_p4, %p151_p3 }
   0xa   : > { %p503_p7 = scmp.ge.s32.totalorder %s680_s21, 1  ;;  %p199_p8 = scmp.lt.s32.totalorder %s680_s21, 4 }
   0xc   : > { %p200_p9 = pnand %p503_p7, %p199_p8 }
   0xd   : > { %s772_s9 = sshll.u32 (!%p200_p9), %s738_s22, 1 }
   0xe   : > { %203 = sbr.rel (%p200_p9) target bundleno = 439 (0x1b7), region = 40  ;;  %p236_p10 = scmp.lt.s32.totalorder (!%p200_p9), %s772_s9, 4 }
  0x13   : > { %v263_v0 = vld [vmem:[%s894_s1 + $0x58] sm:$0x3f]  ;;  %vm278_vm0 = vcmask 1045504   ;;  %v262_v1 = vld [vmem:[%s894_s1 + $0x50] sm:$0xff]  ;;  %v261_v2 = vld [vmem:[%s894_s1 + $0x48] sm:$0xff]  ;;  %s237_s12 = scalar_select %p236_p10, %s772_s9, 4 }
  0x14   : > { %540 = vmatprep.subr.msk.mxu0 %vm278_vm0, %v263_v0  ;;  %v260_v3 = vld [vmem:[%s894_s1 + $0x40] sm:$0xff]  ;;  %vm271_vm1 = vcmask 769024   ;;  %v259_v4 = vld [vmem:[%s894_s1 + $0x38] sm:$0xff]  ;;  %v258_v6 = vld [vmem:[%s894_s1 + $0x30] sm:$0xff]  ;;  %v682_v14 = vmov 1   ;;  %v683_v15 = vmov 0  }
  0x15   : > { %541 = vmatpush3.msk.msra.mxu0 %vm278_vm0, %v263_v0  ;;  %s506_s15 = sshll.u32 %s237_s12, 3  ;;  %v257_v7 = vld [vmem:[%s894_s1 + $0x28] sm:$0xff]  ;;  %v256_v8 = vld [vmem:[%s894_s1 + $0x20] sm:$0xff]  ;;  %v255_v9 = vld [vmem:[%s894_s1 + $0x18] sm:$0xff]  ;;  %610 = vset.pattern.permute.xlu1 %v682_v14  ;;  %s427_s17 = ssub.s32 (%p755_p5), 5, %s772_s9 }
  0x16   : > { %542 = vmatprep.subr.mxu0 %v262_v1  ;;  %s239_s26 = scalar_lea.vmem %s893_s0, %s506_s15  ;;  %v254_v10 = vld [vmem:[%s894_s1 + $0x10] sm:$0xff]  ;;  %v253_v11 = vld [vmem:[%s894_s1 + $0x8] sm:$0xff]  ;;  %v252_v12 = vld [vmem:[%s894_s1] sm:$0xff]  ;;  %609 = vset.pattern.permute.xlu0 %v683_v15  ;;  %p428_p11 = scmp.lt.s32.totalorder (%p755_p5), %s427_s17, 2 }
  0x17   : > { %543 = vmatpush3.msra.mxu0 %v262_v1  ;;  %v788_v5 = vld [vmem:[%s239_s26] sm:$0xff]  ;;  %v251_v13 = vld [vmem:[%s239_s26 + $0x8] sm:$0xff]  ;;  %s228_s26 = sand.u32 1, %s672_s19  }
  0x18   : > { %544 = vmatprep.subr.mxu0 %v261_v2  ;;  %564 = vmatprep.mubr.msk.f32.mxu0 %vm271_vm1, %v788_v5  ;;  %v507_v17 = vld [vmem:[%s895_s2] ss:$0 sm:$0xff]  ;;  %v512_v23 = vld [vmem:[%s896_s3 + $0x1] ss:$0 sm:$0xff]  ;;  %s504_s14 = sshll.u32 %s228_s26, 4  ;;  %s834_s16 = scalar_lea.sflag [#allocation3], %s228_s26 }
  0x19   : > { %545 = vmatpush3.msra.mxu0 %v261_v2  ;;  %v511_v24 = vld [vmem:[%s896_s3] ss:$0 sm:$0xff]  ;;  %s230_s15 = scalar_lea.vmem [#allocation2], %s504_s14 }
  0x1a   : > { %546 = vmatprep.subr.mxu0 %v260_v3  ;;  %v513_v29 = vld [vmem:[%s897_s4] ss:$0 sm:$0xff] }
  0x1b   : > { %547 = vmatpush3.msra.mxu0 %v260_v3 }
  0x1c   : > { %548 = vmatprep.subr.mxu0 %v259_v4 }
  0x1d   : > { %549 = vmatpush3.msra.mxu0 %v259_v4 }
  0x1e   : > { %550 = vmatprep.subr.mxu0 %v258_v6 }
  0x1f   : > { %551 = vmatpush3.msra.mxu0 %v258_v6 }
  0x20   : > { %552 = vmatprep.subr.mxu0 %v257_v7 }
  0x21   : > { %553 = vmatpush3.msra.mxu0 %v257_v7 }
  0x22   : > { %554 = vmatprep.subr.mxu0 %v256_v8 }
  0x23   : > { %555 = vmatpush3.msra.mxu0 %v256_v8 }
  0x24   : > { %556 = vmatprep.subr.mxu0 %v255_v9 }
  0x25   : > { %557 = vmatpush3.msra.mxu0 %v255_v9 }
  0x26   : > { %558 = vmatprep.subr.mxu0 %v254_v10 }
  0x27   : > { %559 = vmatpush3.msra.mxu0 %v254_v10 }
  0x28   : > { %560 = vmatprep.subr.mxu0 %v253_v11 }
  0x29   : > { %561 = vmatpush3.msra.mxu0 %v253_v11 }
  0x2a   : > { %562 = vmatprep.subr.mxu0 %v252_v12 }
  0x2b   : > { %563 = vmatpush3.msra.mxu0 %v252_v12 }
  0x2c   : > { %565 = vmatmul.mubr.msk.f32.vlgmr.msra.gmra.mxu0 %vm271_vm1, %v251_v13 }
  0xec   : > { %v566_v16 = vpop.f32.mrf.mxu0 }
  0xed   : > { %v354_v20 = vadd.f32 %v566_v16, %v507_v17 }
  0xee   : > { %v348_v18 = vpop.f32.mrf.mxu0 }
  0xef   : > { %v349_v19 = vadd.f32 %v507_v17, %v348_v18  ;;  %v358_v22 = vmax.f32 %v354_v20, 0.0 }
  0xf1   : > { %v357_v21 = vmax.f32 %v349_v19, 0.0 }
  0xf3   : > { %378 = vperm.xlu1 %610, %v357_v21   ;;  %362 = vperm.xlu0 %609, %v357_v21  }
  0xf7   : > { %382 = vperm.xlu1 %610, %v358_v22   ;;  %367 = vperm.xlu0 %609, %v358_v22  }
  0xfb   : > { %611 = vset.pattern.permute.xlu0 %v682_v14 }
 0x16e   : > { %v379_v25 = vpop.permute.xlu1 %378  ;;  %v363_v26 = vpop.permute.xlu0 %362 }
 0x16f   : > { %v389_v27 = vmul.f32 %v512_v23, %v379_v25  ;;  %v374_v28 = vmul.f32 %v511_v24, %v363_v26 }
 0x171   : > { %v391_v30 = vadd.f32 %v389_v27, %v374_v28 }
 0x172   : > { %v383_v31 = vpop.permute.xlu1 %382  ;;  %v368_v32 = vpop.permute.xlu0 %367 }
 0x173   : > { %v400_v33 = vadd.f32 %v513_v29, %v391_v30  ;;  %v390_v34 = vmul.f32 %v512_v23, %v383_v31  ;;  %v375_v35 = vmul.f32 %v511_v24, %v368_v32 }
 0x175   : > { %v514_v36 = vmul.f32 -1.442695, %v400_v33  ;;  %v392_v37 = vadd.f32 %v390_v34, %v375_v35 }
 0x177   : > { %612 = vpow2.f32 %v514_v36  ;;  %v401_v38 = vadd.f32 %v513_v29, %v392_v37 }
 0x179   : > { %v515_v39 = vmul.f32 -1.442695, %v401_v38 }
 0x17b   : > { %614 = vpow2.f32 %v515_v39 }
 0x184   : > { %v613_v40 = vpop.eup %612 }
 0x185   : > { %v408_v41 = vadd.f32 1.0, %v613_v40 }
 0x187   : > { %616 = vrcp.f32 %v408_v41 }
 0x188   : > { %v615_v42 = vpop.eup %614 }
 0x189   : > { %v409_v43 = vadd.f32 1.0, %v615_v42 }
 0x18b   : > { %618 = vrcp.f32 %v409_v43 }
 0x194   : > { %v617_v44 = vpop.eup %616 }
 0x195   : > { %v414_v45 = vmul.f32 %v617_v44, %v788_v5 }
 0x197   : > { %416 = vst.msk [vmem:[%s230_s15] sm:$0xff] %vm271_vm1, %v414_v45  ;;  %425 = sbr.rel (!%p755_p5) target bundleno = 439 (0x1b7), region = 44 }
 0x198   : > { %v619_v46 = vpop.eup %618 }
 0x199   : > { %v415_v47 = vmul.f32 %v619_v46, %v251_v13 }
 0x19b   : > { %417 = vst.msk [vmem:[%s230_s15 + $0x8] sm:$0xff] %vm271_vm1, %v415_v47 }
 0x19c   : > { %s906_s17 = smov (!%p428_p11, %s427_s17), 2 }
 0x19d   : > { %s839_s23 = sshll.u32 %s906_s17, 7 }
 0x19e   : > { %s432_s25 = ssub.s32 256, %s839_s23 }
 0x19f   : > { %433 = vsyncadd %s834_s16, %s432_s25  ;;  %p519_p12 = scmp.ne.s32.totalorder %s839_s23, 0  ;;  %s525_s30 = sshll.u32 %s738_s22, 8 }
 0x1a0   : > { %s848_s28 = scalar_lea.hbm %s898_s5, %s525_s30  ;;  %s438_s7 = sshll.u32 %s230_s15, 4  ;;  %s850_s7 = int_to_ptr.vmem [resolvable:$true] %s438_s7 }
 0x1a1   : > { %s620_s9 = scalar_lea.vmem %s850_s7, %s839_s23  ;;  %s684_s8 = smov [#allocation2]  }
 0x1a2   : > { %p621_p13 = scmp.ne.s32.totalorder %s850_s7, %s620_s9  ;;  %s624_s10 = sshll.u32 %s684_s8, 4  ;;  %s625_s10 = int_to_ptr.vmem [resolvable:$false] %s624_s10 }
 0x1a3   : > { %s626_s22 = scalar_lea.vmem %s625_s10, 512  ;;  %p627_p2 = scmp.lt.s32.totalorder %s850_s7, %s625_s10 }
 0x1a4   : > { %p622_p0 = pnand %p621_p13, %p519_p12  ;;  %p628_p3 = scmp.lt.s32.totalorder %s626_s22, %s620_s9 }
 0x1a6   : > { %p623_p1 = pneg %p622_p0  ;;  %p629_p4 = por %p628_p3, %p627_p2 }
 0x1a8   : > { %p630_p5 = pnand %p629_p4, %p623_p1 }
 0x1aa   : > { %633 = shalt.err (!%p630_p5)
}
 0x1ab   : > { %s634_s11 = scalar_lea.hbm %s848_s28, %s839_s23  ;;  %s638_s14 = scalar_lea.hbm %s898_s5, 640 }
 0x1ac   : > { %p635_p7 = scmp.ne.s32.totalorder %s848_s28, %s634_s11  ;;  %p639_p10 = scmp.lt.s32.totalorder %s848_s28, %s898_s5 }
 0x1ad   : > { %p640_p11 = scmp.lt.s32.totalorder %s638_s14, %s634_s11 }
 0x1ae   : > { %p636_p8 = pnand %p635_p7, %p519_p12 }
 0x1af   : > { %p641_p13 = por %p640_p11, %p639_p10 }
 0x1b0   : > { %p637_p9 = pneg %p636_p8 }
 0x1b2   : > { %p642_p0 = pnand %p641_p13, %p637_p9 }
 0x1b4   : > { %645 = shalt.err (!%p642_p0)
}
 0x1b5   : > { %s685_s25 = smov 128   ;;  %s686_s30 = smov 8  }
 0x1b6   : > { %444 = dma.vmem_to_hbm [thread:$0]  (%p519_p12), %s850_s7, %s839_s23, %s848_s28, %s834_s16, %s685_s25, %s685_s25, %s686_s30  }
 0x1b7 PF: > { %p572_p1 = scmp.ge.s32.totalorder %s680_s21, 2  ;;  %s453_s6 = sand.u32 1, %s668_s18  }
 0x1b8   : > { %s454_s26 = scalar_lea.sflag [#allocation3], %s453_s6 }
 0x1b9   : > { %p569_p2 = pnand %p572_p1, %p759_p6 }
 0x1bb   : > { %p570_p3 = pneg %p569_p2 }
 0x1bd   : > { %663 = dma.done.wait (%p570_p3), %s454_s26, 256  }
 0x1be   : > { %665 = vsyncadd (%p570_p3), %s454_s26, 4294967040  ;;  %p15_p4 = scmp.ge.s32.totalorder %s742_s24, 5   ;;  %s901_s18 = smov %s672_s19 }
 0x1bf   : > { %s902_s19 = smov %s676_s20  ;;  %s903_s20 = smov %s753_s27 }
 0x1c0   : > { %s904_s21 = smov %s742_s24  ;;  %17 = sbr.rel (!%p15_p4) target bundleno = 3 (0x3), region = 75 }
 0x1c5   :  { %459 = vsyncpa [#allocation3], 1 }
 0x1c6   :  { %461 = vsyncpa [#allocation3 + $0x1], 1 }

</bundles_post_ra>
